<compile_context>
chip_gen: v7x
topology: tpu7x:2x2x1
jax: 0.10.0
libtpu: 0.0.40
codegen_flags: <defaults>
</compile_context>

<pallas_src>
import jax
import jax.numpy as jnp
from jax.experimental import pallas as pl
from jax.experimental.pallas import tpu as pltpu


def _scale_aware_kernel(w_ref, b_ref, x_ref, out_ref, gp_ref):
    """One batch element per grid step, native (B, H, S, W) layout.

    w_ref:  (S,) f32 in SMEM -- 1x1 conv weights pre-scaled by 1/(9*6)
    b_ref:  (1,) f32 in SMEM -- conv bias folded through hardsigmoid: b/6 + 0.5
    x_ref:  (1, H, S, W) in VMEM -- features in PyTorch layout
    out_ref:(1, H, S, W) in VMEM
    gp_ref: (H+16, W+256) f32 VMEM scratch -- zero-halo buffer for the pooled
            single channel; interior stored at aligned offset (8, 128).
    """
    _, H, S, W = x_ref.shape
    x = x_ref[0].astype(jnp.float32)                     # (H, S, W), f32 accumulation

    # --- 1x1 conv commuted ahead of the pool: weighted sum over S (dense (H, W)) ---
    g = x[:, 0, :] * w_ref[0]
    for s in range(1, S):                                # statically unrolled, S is small
        g = g + x[:, s, :] * w_ref[s]

    # --- zero-halo buffer (zero padding == count_include_pad=True after scaling) ---
    gp_ref[...] = jnp.zeros_like(gp_ref)
    gp_ref[pl.ds(8, H), pl.ds(128, W)] = g               # tile-aligned store
    gp = gp_ref[...]                                     # (H+16, W+256)

    # --- separable 3x3 box sum: rows then cols (4 adds on a single channel) ---
    rs = gp[7:7 + H, :] + gp[8:8 + H, :] + gp[9:9 + H, :]                 # (H, W+256)
    box = rs[:, 127:127 + W] + rs[:, 128:128 + W] + rs[:, 129:129 + W]    # (H, W)

    # --- hardsigmoid(relu(conv)) with constants folded: clamp(box + b', 0.5, 1.0) ---
    pi = jnp.minimum(jnp.maximum(box + b_ref[0], 0.5), 1.0)

    # --- scale the original features, broadcast over the S dim ---
    out_ref[0] = (pi[:, None, :] * x).astype(out_ref.dtype)


def scale_aware_layer(F, weight, bias):
    """F: (B, H, S, W) (PyTorch layout); weight: (S,); bias: (1,)."""
    B, H, S, W = F.shape
    # Fold the avg-pool 1/9 and hardsigmoid 1/6 (+0.5) into the conv params.
    w_scaled = weight.astype(jnp.float32) * (1.0 / 54.0)
    b_scaled = bias.astype(jnp.float32) * (1.0 / 6.0) + 0.5

    nelem = B * H * S * W
    itemsize = jnp.dtype(F.dtype).itemsize
    cost = pl.CostEstimate(
        flops=8 * nelem,
        transcendentals=0,
        bytes_accessed=2 * nelem * itemsize,
    )

    return pl.pallas_call(
        _scale_aware_kernel,
        out_shape=jax.ShapeDtypeStruct((B, H, S, W), F.dtype),
        grid=(B,),
        in_specs=[
            pl.BlockSpec(memory_space=pltpu.MemorySpace.SMEM),        # scaled weights
            pl.BlockSpec(memory_space=pltpu.MemorySpace.SMEM),        # scaled bias
            pl.BlockSpec((1, H, S, W), lambda b: (b, 0, 0, 0)),       # features (native layout)
        ],
        out_specs=pl.BlockSpec((1, H, S, W), lambda b: (b, 0, 0, 0)),
        scratch_shapes=[pltpu.VMEM((H + 16, W + 256), jnp.float32)],  # single-channel halo buf
        compiler_params=pltpu.CompilerParams(
            dimension_semantics=("parallel",)),
        cost_estimate=cost,
    )(w_scaled, b_scaled, F)


def scale_aware_ref(F, weight, bias):
    """Pure-JAX reference mirroring the PyTorch forward exactly."""
    x = jnp.transpose(F, (0, 2, 1, 3))                 # (B, S, H, W)
    B, S, H, W = x.shape
    xpad = jnp.pad(x, ((0, 0), (0, 0), (1, 1), (1, 1)))
    acc = jnp.zeros_like(x)
    for dh in range(3):
        for dw in range(3):
            acc = acc + xpad[:, :, dh:dh + H, dw:dw + W]
    pooled = acc / 9.0
    conv = jnp.einsum("bshw,s->bhw", pooled, weight) + bias[0]
    r = jnp.maximum(conv, 0.0)
    pi = jnp.clip(r / 6.0 + 0.5, 0.0, 1.0)
    out = pi[:, None, :, :] * x
    return jnp.transpose(out, (0, 2, 1, 3))


if __name__ == "__main__":
    key = jax.random.PRNGKey(0)
    B, H, S, W = 2, 16, 4, 16                          # F: (B, H, s_size, W), s_size=4
    kf, kw, kb = jax.random.split(key, 3)
    F = jax.random.normal(kf, (B, H, S, W), jnp.float32)
    # Conv2d(in_channels=s_size, out_channels=1, kernel_size=1) params,
    # deterministically initialized in-script (flattened (1,S,1,1) -> (S,)).
    weight = jax.random.normal(kw, (S,), jnp.float32) * 0.5
    bias = jax.random.normal(kb, (1,), jnp.float32) * 0.1

    out = jax.block_until_ready(scale_aware_layer(F, weight, bias))
    ref = scale_aware_ref(F, weight, bias)
    assert out.shape == F.shape
    assert jnp.allclose(out, ref, atol=1e-5, rtol=1e-5)
    print("KERNEL_OK")
</pallas_src>

<mosaic_0001>
module attributes {stable_mosaic.version = 11 : i64} {
  func.func @_scale_aware_kernel(%arg0: i32, %arg1: memref<4xf32, #tpu.memory_space<smem>>, %arg2: memref<1xf32, #tpu.memory_space<smem>>, %arg3: memref<1x16x4x16xf32, #tpu.memory_space<vmem>>, %arg4: memref<1x16x4x16xf32, #tpu.memory_space<vmem>>, %arg5: memref<32x272xf32, #tpu.memory_space<vmem>>) attributes {dimension_semantics = [#tpu.dimension_semantics<parallel>], iteration_bounds = array<i64: 2>, scalar_prefetch = 0 : i64, scratch_operands = 1 : i64, tpu.core_type = #tpu.core_type<tc>, window_params = [{transform_indices = @transform_0, window_bounds = array<i64: 4>}, {transform_indices = @transform_1, window_bounds = array<i64: 1>}, {transform_indices = @transform_2, window_bounds = array<i64: 1, 16, 4, 16>}, {transform_indices = @transform_3, window_bounds = array<i64: 1, 16, 4, 16>}]} {
    %c0 = arith.constant 0 : index
    %c0_0 = arith.constant 0 : index
    %c0_1 = arith.constant 0 : index
    %c0_2 = arith.constant 0 : index
    %0 = vector.load %arg3[%c0, %c0_0, %c0_1, %c0_2] : memref<1x16x4x16xf32, #tpu.memory_space<vmem>>, vector<1x16x4x16xf32>
    %1 = vector.shape_cast %0 : vector<1x16x4x16xf32> to vector<16x4x16xf32>
    %2 = vector.extract_strided_slice %1 {offsets = [0, 0, 0], sizes = [16, 1, 16], strides = [1, 1, 1]} : vector<16x4x16xf32> to vector<16x1x16xf32>
    %3 = vector.shape_cast %2 : vector<16x1x16xf32> to vector<16x16xf32>
    %c0_3 = arith.constant 0 : index
    %4 = memref.load %arg1[%c0_3] : memref<4xf32, #tpu.memory_space<smem>>
    %5 = vector.broadcast %4 : f32 to vector<16x16xf32>
    %6 = arith.mulf %3, %5 : vector<16x16xf32>
    %7 = vector.extract_strided_slice %1 {offsets = [0, 1, 0], sizes = [16, 1, 16], strides = [1, 1, 1]} : vector<16x4x16xf32> to vector<16x1x16xf32>
    %8 = vector.shape_cast %7 : vector<16x1x16xf32> to vector<16x16xf32>
    %c1 = arith.constant 1 : index
    %9 = memref.load %arg1[%c1] : memref<4xf32, #tpu.memory_space<smem>>
    %10 = vector.broadcast %9 : f32 to vector<16x16xf32>
    %11 = arith.mulf %8, %10 : vector<16x16xf32>
    %12 = arith.addf %6, %11 : vector<16x16xf32>
    %13 = vector.extract_strided_slice %1 {offsets = [0, 2, 0], sizes = [16, 1, 16], strides = [1, 1, 1]} : vector<16x4x16xf32> to vector<16x1x16xf32>
    %14 = vector.shape_cast %13 : vector<16x1x16xf32> to vector<16x16xf32>
    %c2 = arith.constant 2 : index
    %15 = memref.load %arg1[%c2] : memref<4xf32, #tpu.memory_space<smem>>
    %16 = vector.broadcast %15 : f32 to vector<16x16xf32>
    %17 = arith.mulf %14, %16 : vector<16x16xf32>
    %18 = arith.addf %12, %17 : vector<16x16xf32>
    %19 = vector.extract_strided_slice %1 {offsets = [0, 3, 0], sizes = [16, 1, 16], strides = [1, 1, 1]} : vector<16x4x16xf32> to vector<16x1x16xf32>
    %20 = vector.shape_cast %19 : vector<16x1x16xf32> to vector<16x16xf32>
    %c3 = arith.constant 3 : index
    %21 = memref.load %arg1[%c3] : memref<4xf32, #tpu.memory_space<smem>>
    %22 = vector.broadcast %21 : f32 to vector<16x16xf32>
    %23 = arith.mulf %20, %22 : vector<16x16xf32>
    %24 = arith.addf %18, %23 : vector<16x16xf32>
    %cst = arith.constant 0.000000e+00 : f32
    %25 = vector.broadcast %cst : f32 to vector<32x272xf32>
    %c0_4 = arith.constant 0 : index
    %c0_5 = arith.constant 0 : index
    %26 = vector.load %arg5[%c0_4, %c0_5] : memref<32x272xf32, #tpu.memory_space<vmem>>, vector<32x272xf32>
    tpu.vector_store %arg5[%c0_4, %c0_5], %25 {strides = array<i32>} : memref<32x272xf32, #tpu.memory_space<vmem>>, vector<32x272xf32>,
    %c8 = arith.constant 8 : index
    %c128 = arith.constant 128 : index
    %27 = vector.load %arg5[%c8, %c128] : memref<32x272xf32, #tpu.memory_space<vmem>>, vector<16x16xf32>
    tpu.vector_store %arg5[%c8, %c128], %24 {strides = array<i32>} : memref<32x272xf32, #tpu.memory_space<vmem>>, vector<16x16xf32>,
    %c0_6 = arith.constant 0 : index
    %c0_7 = arith.constant 0 : index
    %28 = vector.load %arg5[%c0_6, %c0_7] : memref<32x272xf32, #tpu.memory_space<vmem>>, vector<32x272xf32>
    %29 = vector.extract_strided_slice %28 {offsets = [7, 0], sizes = [16, 272], strides = [1, 1]} : vector<32x272xf32> to vector<16x272xf32>
    %30 = vector.extract_strided_slice %28 {offsets = [8, 0], sizes = [16, 272], strides = [1, 1]} : vector<32x272xf32> to vector<16x272xf32>
    %31 = arith.addf %29, %30 : vector<16x272xf32>
    %32 = vector.extract_strided_slice %28 {offsets = [9, 0], sizes = [16, 272], strides = [1, 1]} : vector<32x272xf32> to vector<16x272xf32>
    %33 = arith.addf %31, %32 : vector<16x272xf32>
    %34 = vector.extract_strided_slice %33 {offsets = [0, 127], sizes = [16, 16], strides = [1, 1]} : vector<16x272xf32> to vector<16x16xf32>
    %35 = vector.extract_strided_slice %33 {offsets = [0, 128], sizes = [16, 16], strides = [1, 1]} : vector<16x272xf32> to vector<16x16xf32>
    %36 = arith.addf %34, %35 : vector<16x16xf32>
    %37 = vector.extract_strided_slice %33 {offsets = [0, 129], sizes = [16, 16], strides = [1, 1]} : vector<16x272xf32> to vector<16x16xf32>
    %38 = arith.addf %36, %37 : vector<16x16xf32>
    %c0_8 = arith.constant 0 : index
    %39 = memref.load %arg2[%c0_8] : memref<1xf32, #tpu.memory_space<smem>>
    %40 = vector.broadcast %39 : f32 to vector<16x16xf32>
    %41 = arith.addf %38, %40 : vector<16x16xf32>
    %cst_9 = arith.constant 5.000000e-01 : f32
    %42 = vector.broadcast %cst_9 : f32 to vector<16x16xf32>
    %43 = arith.maximumf %41, %42 : vector<16x16xf32>
    %cst_10 = arith.constant 1.000000e+00 : f32
    %44 = vector.broadcast %cst_10 : f32 to vector<16x16xf32>
    %45 = arith.minimumf %43, %44 : vector<16x16xf32>
    %46 = vector.shape_cast %45 : vector<16x16xf32> to vector<16x1x16xf32>
    %47 = vector.broadcast %46 : vector<16x1x16xf32> to vector<16x4x16xf32>
    %48 = arith.mulf %47, %1 : vector<16x4x16xf32>
    %c0_11 = arith.constant 0 : index
    %c0_12 = arith.constant 0 : index
    %c0_13 = arith.constant 0 : index
    %c0_14 = arith.constant 0 : index
    %49 = vector.load %arg4[%c0_11, %c0_12, %c0_13, %c0_14] : memref<1x16x4x16xf32, #tpu.memory_space<vmem>>, vector<1x16x4x16xf32>
    %50 = vector.shape_cast %49 : vector<1x16x4x16xf32> to vector<16x4x16xf32>
    %51 = vector.shape_cast %48 : vector<16x4x16xf32> to vector<1x16x4x16xf32>
    tpu.vector_store %arg4[%c0_11, %c0_12, %c0_13, %c0_14], %51 {strides = array<i32>} : memref<1x16x4x16xf32, #tpu.memory_space<vmem>>, vector<1x16x4x16xf32>,
    return
  }
  func.func @transform_0(%arg0: i32) -> i32 {
    %c0_i32 = arith.constant 0 : i32
    %c0_i32_0 = arith.constant 0 : i32
    return %c0_i32 : i32
  }
  func.func @transform_1(%arg0: i32) -> i32 {
    %c0_i32 = arith.constant 0 : i32
    %c0_i32_0 = arith.constant 0 : i32
    return %c0_i32 : i32
  }
  func.func @transform_2(%arg0: i32) -> (i32, i32, i32, i32) {
    %c0_i32 = arith.constant 0 : i32
    %c0_i32_0 = arith.constant 0 : i32
    %c0_i32_1 = arith.constant 0 : i32
    %c0_i32_2 = arith.constant 0 : i32
    return %arg0, %c0_i32, %c0_i32_0, %c0_i32_1 : i32, i32, i32, i32
  }
  func.func @transform_3(%arg0: i32) -> (i32, i32, i32, i32) {
    %c0_i32 = arith.constant 0 : i32
    %c0_i32_0 = arith.constant 0 : i32
    %c0_i32_1 = arith.constant 0 : i32
    %c0_i32_2 = arith.constant 0 : i32
    return %arg0, %c0_i32, %c0_i32_0, %c0_i32_1 : i32, i32, i32, i32
  }
}

</mosaic_0001>

<bundles_post_ra>
// kernel: tpu_custom_call.1
= control target key start
LH: loop header
LB: loop body
LE: loop exit
PB: predicated region body
PF: predicated region fallthrough
CT: control target
= control target key end

     0   :  { %s2172_s0 = inlined_call_operand.vmem [shape: f32[4], index: 0, kind: input, shape index: {}]   ;;  %s2173_s1 = inlined_call_operand.<no memory space> [shape: f32[1], index: 1, kind: input, shape index: {}]   ;;  %s2174_s2 = inlined_call_operand.hbm [shape: f32[2,16,4,16], index: 2, kind: input, shape index: {}]   ;;  %s2175_s3 = inlined_call_operand.hbm [shape: f32[2,16,4,16], index: 3, kind: output, shape index: {}]  }
   0x1   :  { %8 = sst [smem:[#allocation3]] %s2173_s1 }
   0x2   :  { %9 = vsyncpa [#allocation7], 0 }
   0x3   :  { %10 = vsyncpa [#allocation5], 0 }
   0x4   :  { %12 = vsyncpa [#allocation5 + $0x1], 0 }
   0x5   :  { %13 = vsyncpa [#allocation6], 0 }
   0x6   :  { %15 = vsyncpa [#allocation6 + $0x1], 0  ;;  %s1523_s14 = smov 0   ;;  %s1525_s15 = smov 0  }
   0x7   :  { %s1527_s16 = smov 0   ;;  %s1529_s17 = smov 0  }
   0x8 LB: > { %s1544_s1 = sadd.s32 4294967295, %s1486_s17   ;;  %s1284_s18 = sadd.s32 4294967294, %s1486_s17   ;;  %s1486_s17 = sphi %s1529_s17, %s2195_s17   ;;  %s1482_s16 = sphi %s1527_s16, %s2194_s16   ;;  %s1478_s15 = sphi %s1525_s15, %s2193_s15   ;;  %s1474_s14 = sphi %s1523_s14, %s2192_s14  }
   0x9   : > { %s1548_s19 = sadd.s32 1, %s1486_s17   ;;  %s70_s20 = sadd.s32 1, %s1482_s16 }
   0xa   : > { %s67_s21 = ssub.s32 %s1486_s17, %s1548_s19  ;;  %p77_p0 = scmp.ne.s32.totalorder %s1482_s16, %s1478_s15 }
   0xb   : > { %p68_p1 = scmp.eq.s32.totalorder %s67_s21, 0  ;;  %p78_p2 = scmp.eq.s32.totalorder %s1486_s17, 0 }
   0xc   : > { %p83_p3 = scmp.ne.s32.totalorder %s1478_s15, %s1474_s14  ;;  %p2177_p4 = scmp.eq.s32.totalorder %s1544_s1, 0 }
   0xd   : > { %s1560_s22 = scalar_select %p68_p1, %s1482_s16, %s70_s20  }
   0xe   : > { %p1562_p5 = por %p78_p2, %p77_p0  ;;  %p1568_p6 = por %p2177_p4, %p83_p3 }
   0xf   : > { %p107_p7 = scmp.eq.s32.totalorder %s1544_s1, 1  ;;  %p113_p8 = scmp.eq.s32.totalorder %s1284_s18, 1 }
  0x10   : > { %s2180_s24 = scalar_select %p1568_p6, 1, 0 }
  0x11   : > { %p1285_p9 = scmp.ge.s32.totalorder %s1486_s17, 1  ;;  %p120_p10 = scmp.lt.s32.totalorder %s1486_s17, 3 }
  0x12   : > { %p1575_p11 = por %p107_p7, %p77_p0  ;;  %p1579_p12 = por %p113_p8, %p83_p3 }
  0x13   : > { %p1583_p13 = pnand %p1285_p9, %p120_p10  ;;  %s133_s30 = sshll.u32 %s2172_s0, 4  ;;  %s134_s30 = int_to_ptr.vmem [resolvable:$true] %s133_s30 }
  0x14   : > { %s2181_s25 = scalar_select %p1575_p11, 1, 0 }
  0x15   : > { %s2182_s26 = scalar_select %p1579_p12, 1, 0 }
  0x16   : > { %p1313_p1 = pneg %p1583_p13  ;;  %p1326_p2 = scmp.lt.s32.totalorder %s1486_s17, 2 }
  0x17   : > { %s147_s5 = sand.u32 1, %s1482_s16   ;;  %s1371_s8 = scalar_lea.vmem %s134_s30, 16 }
  0x18   : > { %p1596_p7 = pnand %p1313_p1, %p2177_p4  ;;  %p1603_p3 = pnand %p1326_p2, %p1562_p5 }
  0x19   : > { %s1288_s7 = sshll.u32 %s147_s5, 6  ;;  %p1372_p8 = scmp.ne.s32.totalorder %s134_s30, %s1371_s8 }
  0x1a   : > { %p1373_p9 = pneg %p1596_p7  ;;  %p1379_p12 = scmp.lt.s32.totalorder %s134_s30, %s134_s30 }
  0x1b   : > { %p1380_p11 = scmp.lt.s32.totalorder %s1371_s8, %s1371_s8 }
  0x1c   : > { %p1374_p10 = pnand %p1373_p9, %p1372_p8 }
  0x1d   : > { %p1381_p1 = por %p1380_p11, %p1379_p12 }
  0x1e   : > { %p1375_p0 = pneg %p1374_p10 }
  0x20   : > { %p1382_p4 = pnand %p1381_p1, %p1375_p0 }
  0x22   : > { %1385 = shalt.err (!%p1382_p4)
}
  0x23   : > { %s1488_s9 = smov [#allocation4]   ;;  %s1303_s10 = sshll.u32 %s1486_s17, 10 }
  0x24   : > { %1316 = dma.vmem_to_smem (!%p1596_p7), %s134_s30, 16, %s1488_s9, [#allocation7]  }
  0x25   : > { %s151_s11 = scalar_lea.vmem [#allocation8], %s1288_s7  ;;  %s1615_s20 = scalar_lea.hbm %s2174_s2, %s1303_s10 }
  0x26   : > { %s158_s12 = sshll.u32 %s151_s11, 4  ;;  %s1619_s21 = scalar_lea.sflag [#allocation5], %s147_s5  ;;  %s1617_s12 = int_to_ptr.vmem [resolvable:$true] %s158_s12 }
  0x27   : > { %s1386_s23 = scalar_lea.hbm %s1615_s20, 1024  ;;  %p1388_p5 = pneg %p1603_p3 }
  0x28   : > { %p1387_p4 = scmp.ne.s32.totalorder %s1615_s20, %s1386_s23  ;;  %s1391_s30 = scalar_lea.hbm %s2174_s2, 2048 }
  0x29   : > { %p1392_p0 = scmp.lt.u32.totalorder %s1615_s20, %s2174_s2  ;;  %p1393_p2 = scmp.lt.u32.totalorder %s1391_s30, %s1386_s23 }
  0x2a   : > { %p1389_p11 = pnand %p1388_p5, %p1387_p4  ;;  %p1395_p8 = scmp.lt.u32.totalorder %s1386_s23, %s1615_s20 }
  0x2b   : > { %p1394_p7 = por %p1393_p2, %p1392_p0 }
  0x2c   : > { %p1390_p12 = pneg %p1389_p11 }
  0x2d   : > { %p1396_p9 = por %p1395_p8, %p1394_p7 }
  0x2f   : > { %p1397_p10 = pnand %p1396_p9, %p1390_p12 }
  0x31   : > { %1400 = shalt.err (!%p1397_p10)
}
  0x32   : > { %s1401_s5 = scalar_lea.vmem %s1617_s12, 1024  ;;  %s1489_s8 = smov [#allocation8]  }
  0x33   : > { %p1402_p1 = scmp.ne.s32.totalorder %s1617_s12, %s1401_s5  ;;  %s1406_s9 = sshll.u32 %s1489_s8, 4  ;;  %s1407_s9 = int_to_ptr.vmem [resolvable:$false] %s1406_s9 }
  0x34   : > { %s1408_s10 = scalar_lea.vmem %s1407_s9, 2048  ;;  %p1409_p6 = scmp.lt.s32.totalorder %s1617_s12, %s1407_s9 }
  0x35   : > { %p1404_p4 = pnand %p1402_p1, %p1388_p5  ;;  %p1410_p0 = scmp.lt.s32.totalorder %s1408_s10, %s1401_s5 }
  0x37   : > { %p1405_p11 = pneg %p1404_p4  ;;  %p1411_p2 = por %p1410_p0, %p1409_p6 }
  0x39   : > { %p1412_p7 = pnand %p1411_p2, %p1405_p11 }
  0x3b   : > { %1415 = shalt.err (!%p1412_p7)
}
  0x3c   : > { %s1490_s11 = smov 64   ;;  %s1491_s13 = smov 4  }
  0x3d   : > { %1320 = dma.hbm_to_vmem [thread:$0]  (!%p1603_p3), %s1615_s20, 1024, %s1617_s12, %s1619_s21, %s1490_s11, %s1490_s11, %s1491_s13  }
  0x3e   : > { %170 = sbr.rel (%p1583_p13) target bundleno = 481 (0x1e1), region = 32  ;;  %p2186_p5 = scmp.eq.s32.totalorder (!%p1583_p13), %s1544_s1, 0 }
  0x45   : > { %1461 = dma.done.wait (%p2186_p5), [#allocation7], 16   ;;  %p2187_p12 = pmov %p2186_p5 }
  0x46   : > { %s1654_s18 = sand.u32 1, %s1478_s15   ;;  %p2188_p6 = scmp.ne.s32.totalorder %s2180_s24, 0 }
  0x47   : > { %1463 = vsyncadd (%p2187_p12), [#allocation7], 4294967280  ;;  %s1293_s23 = sshll.u32 %s1654_s18, 6  ;;  %s177_s28 = scalar_lea.sflag [#allocation5], %s1654_s18 }
  0x48   : > { %s1660_s6 = scalar_lea.vmem [#allocation8], %s1293_s23 }
  0x49   : > { %1465 = dma.done.wait (%p2188_p6), %s177_s28, 1024  }
  0x4a   : > { %1467 = vsyncadd (%p2188_p6), %s177_s28, 4294966272 }
  0x4b   : > { %185 = sfence }
  0x4c   : > { %s220_s27 = sld [smem:[#allocation4]]  ;;  %s1295_s12 = sld [smem:[#allocation4 + $0x1]]  ;;  %v205_v0 = vld [vmem:[%s1660_s6 + $0x4] sm:$0xf]  ;;  %v204_v1 = vld [vmem:[%s1660_s6] sm:$0xf] }
  0x4d   : > { %s1296_s20 = sld [smem:[#allocation4 + $0x2]]  ;;  %s1297_s21 = sld [smem:[#allocation4 + $0x3]]  ;;  %v1671_v2 = vld [vmem:[%s1660_s6 + $0x20] sm:$0xf]  ;;  %v1674_v3 = vld [vmem:[%s1660_s6 + $0x24] sm:$0xf] }
  0x4e   : > { %s1492_s29 = smov 127   ;;  %v1681_v6 = vld [vmem:[%s1660_s6 + $0xc] sm:$0xf]  ;;  %v1684_v7 = vld [vmem:[%s1660_s6 + $0x8] sm:$0xf]  ;;  %vm486_vm0 = vcmask 130048  }
  0x4f   : > { %961 = vrot.lane.b32.xlu1 %v205_v0, %s1492_s29  ;;  %959 = vrot.lane.b32.xlu0 %v204_v1, %s1492_s29  ;;  %v1493_v8 = vmov 0.0   ;;  %v1715_v25 = vld [vmem:[%s1660_s6 + $0x14] sm:$0xf]  ;;  %v1718_v26 = vld [vmem:[%s1660_s6 + $0x10] sm:$0xf]  ;;  %vm514_vm1 = vcmask 1041409  }
  0x50   : > { %489 = vst [vmem:[#allocation2 + $0x20] sm:$0xff] %v1493_v8  ;;  %492 = vst [vmem:[#allocation2 + $0x38] sm:$0xff] %v1493_v8  ;;  %v1731_v42 = vld [vmem:[%s1660_s6 + $0x1c] sm:$0xf]  ;;  %v1734_v43 = vld [vmem:[%s1660_s6 + $0x18] sm:$0xf] }
  0x51   : > { %v1747_v56 = vld [vmem:[%s1660_s6 + $0x28] sm:$0xf]  ;;  %vm517_vm2 = vcmask 1042434   ;;  %vm520_vm3 = vcmask 1043459   ;;  %vm523_vm4 = vcmask 1044484   ;;  %vm526_vm5 = vcmask 1045509  }
  0x52   : > { %v1676_v4 = vstv %s220_s27  ;;  %v1678_v5 = vstv %s1295_s12  ;;  %vm529_vm6 = vcmask 1046534   ;;  %vm532_vm7 = vcmask 1047559   ;;  %s1494_s24 = smov 126   ;;  %s641_s30 = sld [smem:[#allocation3]] }
  0x53   : > { %v1688_v9 = vstv %s1296_s20  ;;  %v1690_v10 = vstv %s1297_s21  ;;  %v223_v11 = vmul.f32 %v1676_v4, %v205_v0  ;;  %v241_v12 = vmul.f32 %v1678_v5, %v205_v0  ;;  %965 = vrot.lane.b32.xlu1 %v1681_v6, %s1492_s29  ;;  %963 = vrot.lane.b32.xlu0 %v1684_v7, %s1492_s29  ;;  %s1496_s4 = smov 1   ;;  %s2072_s7 = scalar_lea.vmem [#allocation9], %s1293_s23 }
  0x54   : > { %v323_v13 = vmul.f32 %v1688_v9, %v205_v0  ;;  %v405_v14 = vmul.f32 %v1690_v10, %v205_v0  ;;  %v230_v15 = vmul.f32 %v1676_v4, %v1671_v2  ;;  %v231_v16 = vmul.f32 %v1676_v4, %v1674_v3  ;;  %s1304_s5 = sshll.u32 %s1544_s1, 10  ;;  %s1199_s8 = sshll.u32 %s2072_s7, 4  ;;  %s2125_s8 = int_to_ptr.vmem [resolvable:$true] %s1199_s8 }
  0x55   : > { %v273_v17 = vrot.slane %v241_v12, 1  ;;  %v248_v18 = vmul.f32 %v1678_v5, %v1671_v2  ;;  %v249_v19 = vmul.f32 %v1678_v5, %v1674_v3  ;;  %v330_v20 = vmul.f32 %v1688_v9, %v1671_v2  ;;  %s2123_s11 = scalar_lea.hbm %s2175_s3, %s1304_s5  ;;  %s1186_s1 = scalar_lea.sflag [#allocation6], %s1654_s18 }
  0x56   : > { %v355_v21 = vrot.slane %v323_v13, 2  ;;  %v437_v22 = vrot.slane %v405_v14, 3  ;;  %v331_v23 = vmul.f32 %v1688_v9, %v1674_v3  ;;  %v412_v24 = vmul.f32 %v1690_v10, %v1671_v2  ;;  %s1416_s13 = scalar_lea.vmem %s2125_s8, 1024  ;;  %p2189_p3 = scmp.ne.s32.totalorder %s2181_s25, 0 }
  0x57   : > { %v305_v27 = vadd.f32 %v273_v17, %v223_v11  ;;  %v280_v28 = vrot.slane %v248_v18, 1  ;;  %v281_v29 = vrot.slane %v249_v19, 1  ;;  %v362_v30 = vrot.slane %v330_v20, 2  ;;  %969 = vrot.lane.b32.xlu1 %v1715_v25, %s1492_s29  ;;  %967 = vrot.lane.b32.xlu0 %v1718_v26, %s1492_s29  ;;  %p1417_p13 = scmp.ne.s32.totalorder %s2125_s8, %s1416_s13  ;;  %s1497_s23 = smov [#allocation9]  }
  0x58   : > { %v363_v31 = vrot.slane %v331_v23, 2  ;;  %v413_v32 = vmul.f32 %v1690_v10, %v1674_v3  ;;  %v222_v33 = vmul.f32 %v1676_v4, %v204_v1  ;;  %v240_v37 = vmul.f32 %v1678_v5, %v204_v1  ;;  %s1420_s28 = sshll.u32 %s1497_s23, 4  ;;  %s1421_s28 = int_to_ptr.vmem [resolvable:$false] %s1420_s28 }
  0x59   : > { %v387_v34 = vadd.f32 %v355_v21, %v305_v27  ;;  %v312_v35 = vadd.f32 %v280_v28, %v230_v15  ;;  %v313_v36 = vadd.f32 %v281_v29, %v231_v16  ;;  %v444_v38 = vrot.slane %v412_v24, 3  ;;  %p1418_p8 = pnand %p1417_p13, %p2189_p3  ;;  %p1423_p10 = scmp.lt.s32.totalorder %s2125_s8, %s1421_s28 }
  0x5a   : > { %v445_v39 = vrot.slane %v413_v32, 3  ;;  %v322_v40 = vmul.f32 %v1688_v9, %v204_v1  ;;  %v404_v41 = vmul.f32 %v1690_v10, %v204_v1  ;;  %v272_v47 = vrot.slane %v240_v37, 1  ;;  %v1778_v37 = vld [vmem:[%s1660_s6 + $0x2c] sm:$0xf] }
  0x5b   : > { %v469_v44 = vadd.f32 %v437_v22, %v387_v34  ;;  %v394_v45 = vadd.f32 %v362_v30, %v312_v35  ;;  %v395_v46 = vadd.f32 %v363_v31, %v313_v36  ;;  %973 = vrot.lane.b32.xlu1 %v1731_v42, %s1492_s29  ;;  %971 = vrot.lane.b32.xlu0 %v1734_v43, %s1492_s29  ;;  %vm585_vm8 = vcmask 1045504   ;;  %p1419_p9 = pneg %p1418_p8 }
  0x5c   : > { %v354_v48 = vrot.slane %v322_v40, 2  ;;  %v225_v49 = vmul.f32 %v1676_v4, %v1681_v6  ;;  %v243_v50 = vmul.f32 %v1678_v5, %v1681_v6  ;;  %v325_v51 = vmul.f32 %v1688_v9, %v1681_v6 }
  0x5d   : > { %v513_v52 = vrot.slane %v469_v44, 7  ;;  %v477_v53 = vadd.f32 %v445_v39, %v395_v46  ;;  %v304_v54 = vadd.f32 %v272_v47, %v222_v33  ;;  %v436_v55 = vrot.slane %v404_v41, 3 }
  0x5e   : > { %v476_v57 = vadd.f32 %v444_v38, %v394_v45  ;;  %v275_v58 = vrot.slane %v243_v50, 1  ;;  %v357_v59 = vrot.slane %v325_v51, 2  ;;  %v407_v60 = vmul.f32 %v1690_v10, %v1681_v6  ;;  %v1781_v38 = vld [vmem:[%s1660_s6 + $0x30] sm:$0xf] }
  0x5f   : > { %v534_v61 = vrot.slane %v477_v53, 7  ;;  %v386_v62 = vadd.f32 %v354_v48, %v304_v54  ;;  %v224_v63 = vmul.f32 %v1676_v4, %v1684_v7  ;;  %v242_v0 = vmul.f32 %v1678_v5, %v1684_v7 }
  0x60   : > { %v307_v1 = vadd.f32 %v275_v58, %v225_v49  ;;  %v232_v11 = vmul.f32 %v1676_v4, %v1747_v56  ;;  %v250_v12 = vmul.f32 %v1678_v5, %v1747_v56  ;;  %v324_v13 = vmul.f32 %v1688_v9, %v1684_v7 }
  0x61   : > { %v468_v14 = vadd.f32 %v436_v55, %v386_v62  ;;  %v439_v6 = vrot.slane %v407_v60, 3  ;;  %v274_v15 = vrot.slane %v242_v0, 1  ;;  %v332_v16 = vmul.f32 %v1688_v9, %v1747_v56 }
  0x62   : > { %v389_v17 = vadd.f32 %v357_v59, %v307_v1  ;;  %v282_v18 = vrot.slane %v250_v12, 1  ;;  %v356_v19 = vrot.slane %v324_v13, 2  ;;  %v406_v20 = vmul.f32 %v1690_v10, %v1684_v7 }
  0x63   : > { %v535_v21 = vsel %vm514_vm1, %v534_v61, %v476_v57  ;;  %v306_v22 = vadd.f32 %v274_v15, %v224_v63  ;;  %v364_v23 = vrot.slane %v332_v16, 2  ;;  %v414_v24 = vmul.f32 %v1690_v10, %v1747_v56 }
  0x64   : > { %v515_v27 = vsel %vm514_vm1, %v513_v52, %v468_v14  ;;  %v314_v28 = vadd.f32 %v282_v18, %v232_v11  ;;  %v438_v29 = vrot.slane %v406_v20, 3  ;;  %v227_v30 = vmul.f32 %v1676_v4, %v1715_v25 }
  0x65   : > { %v388_v31 = vadd.f32 %v356_v19, %v306_v22  ;;  %v446_v32 = vrot.slane %v414_v24, 3  ;;  %v245_v7 = vmul.f32 %v1678_v5, %v1715_v25  ;;  %v327_v33 = vmul.f32 %v1688_v9, %v1715_v25 }
  0x66   : > { %v471_v34 = vadd.f32 %v439_v6, %v389_v17  ;;  %v396_v35 = vadd.f32 %v364_v23, %v314_v28  ;;  %v409_v36 = vmul.f32 %v1690_v10, %v1715_v25  ;;  %v226_v39 = vmul.f32 %v1676_v4, %v1718_v26 }
  0x67   : > { %v470_v40 = vadd.f32 %v438_v29, %v388_v31  ;;  %v277_v41 = vrot.slane %v245_v7, 1  ;;  %v359_v44 = vrot.slane %v327_v33, 2  ;;  %v233_v45 = vmul.f32 %v1676_v4, %v1778_v37  ;;  %v1822_v33 = vld [vmem:[%s1660_s6 + $0x34] sm:$0xf] }
  0x68   : > { %v478_v46 = vadd.f32 %v446_v32, %v396_v35  ;;  %v441_v47 = vrot.slane %v409_v36, 3  ;;  %v234_v48 = vmul.f32 %v1676_v4, %v1781_v38  ;;  %v244_v25 = vmul.f32 %v1678_v5, %v1718_v26 }
  0x69   : > { %v516_v49 = vrot.slane %v470_v40, 6  ;;  %v309_v50 = vadd.f32 %v277_v41, %v227_v30  ;;  %v251_v51 = vmul.f32 %v1678_v5, %v1778_v37  ;;  %v252_v52 = vmul.f32 %v1678_v5, %v1781_v38  ;;  %v1827_v40 = vld [vmem:[%s1660_s6 + $0x38] sm:$0xf]  ;;  %v1830_v41 = vld [vmem:[%s1660_s6 + $0x3c] sm:$0xf]  ;;  %s1422_s6 = scalar_lea.vmem %s1421_s28, 2048 }
  0x6a   : > { %v519_v53 = vrot.slane %v471_v34, 5  ;;  %v276_v54 = vrot.slane %v244_v25, 1  ;;  %v326_v55 = vmul.f32 %v1688_v9, %v1718_v26  ;;  %v333_v57 = vmul.f32 %v1688_v9, %v1778_v37  ;;  %p1424_p1 = scmp.lt.s32.totalorder %s1422_s6, %s1416_s13 }
  0x6b   : > { %v536_v58 = vrot.slane %v478_v46, 6  ;;  %v391_v59 = vadd.f32 %v359_v44, %v309_v50  ;;  %v283_v60 = vrot.slane %v251_v51, 1  ;;  %v284_v61 = vrot.slane %v252_v52, 1 }
  0x6c   : > { %v518_v62 = vsel %vm517_vm2, %v516_v49, %v515_v27  ;;  %v308_v63 = vadd.f32 %v276_v54, %v226_v39  ;;  %v334_v0 = vmul.f32 %v1688_v9, %v1781_v38  ;;  %v358_v1 = vrot.slane %v326_v55, 2  ;;  %p1425_p4 = por %p1424_p1, %p1423_p10 }
  0x6d   : > { %v1802_v11 = vadd.f32 %v441_v47, %v391_v59  ;;  %v315_v12 = vadd.f32 %v283_v60, %v233_v45  ;;  %v316_v13 = vadd.f32 %v284_v61, %v234_v48  ;;  %v365_v14 = vrot.slane %v333_v57, 2 }
  0x6e   : > { %v366_v6 = vrot.slane %v334_v0, 2  ;;  %v390_v15 = vadd.f32 %v358_v1, %v308_v63  ;;  %v408_v16 = vmul.f32 %v1690_v10, %v1718_v26  ;;  %v415_v17 = vmul.f32 %v1690_v10, %v1778_v37  ;;  %p1426_p11 = pnand %p1425_p4, %p1419_p9 }
  0x6f   : > { %v537_v18 = vsel %vm517_vm2, %v536_v58, %v535_v21  ;;  %v525_v19 = vrot.slane %v1802_v11, 3  ;;  %v397_v20 = vadd.f32 %v365_v14, %v315_v12  ;;  %v416_v22 = vmul.f32 %v1690_v10, %v1781_v38 }
  0x70   : > { %v398_v23 = vadd.f32 %v366_v6, %v316_v13  ;;  %v440_v24 = vrot.slane %v408_v16, 3  ;;  %v447_v27 = vrot.slane %v415_v17, 3  ;;  %v229_v26 = vmul.f32 %v1676_v4, %v1731_v42 }
  0x71   : > { %v448_v28 = vrot.slane %v416_v22, 3  ;;  %v247_v29 = vmul.f32 %v1678_v5, %v1731_v42  ;;  %v329_v21 = vmul.f32 %v1688_v9, %v1731_v42  ;;  %v411_v30 = vmul.f32 %v1690_v10, %v1731_v42 }
  0x72   : > { %v472_v31 = vadd.f32 %v440_v24, %v390_v15  ;;  %v479_v32 = vadd.f32 %v447_v27, %v397_v20  ;;  %v521_v7 = vsel %vm520_vm3, %v519_v53, %v518_v62  ;;  %v228_v34 = vmul.f32 %v1676_v4, %v1734_v43 }
  0x73   : > { %v480_v35 = vadd.f32 %v448_v28, %v398_v23  ;;  %v279_v36 = vrot.slane %v247_v29, 1  ;;  %v361_v39 = vrot.slane %v329_v21, 2  ;;  %v235_v44 = vmul.f32 %v1676_v4, %v1822_v33 }
  0x74   : > { %v522_v42 = vrot.slane %v472_v31, 4  ;;  %v538_v45 = vrot.slane %v479_v32, 5  ;;  %v443_v46 = vrot.slane %v411_v30, 3  ;;  %v236_v47 = vmul.f32 %v1676_v4, %v1827_v40 }
  0x75   : > { %v311_v48 = vadd.f32 %v279_v36, %v229_v26  ;;  %v237_v25 = vmul.f32 %v1676_v4, %v1830_v41  ;;  %v246_v49 = vmul.f32 %v1678_v5, %v1734_v43  ;;  %v253_v50 = vmul.f32 %v1678_v5, %v1822_v33 }
  0x76   : > { %v539_v51 = vsel %vm520_vm3, %v538_v45, %v537_v18  ;;  %v540_v52 = vrot.slane %v480_v35, 4  ;;  %v254_v53 = vmul.f32 %v1678_v5, %v1827_v40  ;;  %v255_v54 = vmul.f32 %v1678_v5, %v1830_v41 }
  0x77   : > { %v524_v55 = vsel %vm523_vm4, %v522_v42, %v521_v7  ;;  %v393_v57 = vadd.f32 %v361_v39, %v311_v48  ;;  %v278_v4 = vrot.slane %v246_v49, 1  ;;  %v285_v58 = vrot.slane %v253_v50, 1 }
  0x78   : > { %v286_v59 = vrot.slane %v254_v53, 1  ;;  %v287_v60 = vrot.slane %v255_v54, 1  ;;  %v328_v61 = vmul.f32 %v1688_v9, %v1734_v43  ;;  %v335_v62 = vmul.f32 %v1688_v9, %v1822_v33 }
  0x79   : > { %v475_v63 = vadd.f32 %v443_v46, %v393_v57  ;;  %v310_v0 = vadd.f32 %v278_v4, %v228_v34  ;;  %v317_v1 = vadd.f32 %v285_v58, %v235_v44  ;;  %v336_v12 = vmul.f32 %v1688_v9, %v1827_v40 }
  0x7a   : > { %v318_v5 = vadd.f32 %v286_v59, %v236_v47  ;;  %v319_v13 = vadd.f32 %v287_v60, %v237_v25  ;;  %v337_v14 = vmul.f32 %v1688_v9, %v1830_v41  ;;  %v360_v6 = vrot.slane %v328_v61, 2 }
  0x7b   : > { %v541_v15 = vsel %vm523_vm4, %v540_v52, %v539_v51  ;;  %v367_v16 = vrot.slane %v335_v62, 2  ;;  %v368_v17 = vrot.slane %v336_v12, 2  ;;  %v410_v18 = vmul.f32 %v1690_v10, %v1734_v43 }
  0x7c   : > { %v369_v20 = vrot.slane %v337_v14, 2  ;;  %v392_v22 = vadd.f32 %v360_v6, %v310_v0  ;;  %v417_v23 = vmul.f32 %v1690_v10, %v1822_v33  ;;  %v418_v24 = vmul.f32 %v1690_v10, %v1827_v40 }
  0x7d   : > { %v399_v27 = vadd.f32 %v367_v16, %v317_v1  ;;  %v400_v26 = vadd.f32 %v368_v17, %v318_v5  ;;  %v419_v9 = vmul.f32 %v1690_v10, %v1830_v41  ;;  %v442_v28 = vrot.slane %v410_v18, 3 }
  0x7e   : > { %v531_v29 = vrot.slane %v475_v63, 1  ;;  %v401_v21 = vadd.f32 %v369_v20, %v319_v13  ;;  %v449_v30 = vrot.slane %v417_v23, 3  ;;  %v450_v31 = vrot.slane %v418_v24, 3 }
  0x7f   : > { %v451_v32 = vrot.slane %v419_v9, 3  ;;  %v474_v43 = vadd.f32 %v442_v28, %v392_v22  ;;  %v527_v35 = vsel %vm526_vm5, %v525_v19, %v524_v55  ;;  %v594_v36 = vrot.slane %v1493_v8, 2 }
  0x80   : > { %v481_v7 = vadd.f32 %v449_v30, %v399_v27  ;;  %v482_v34 = vadd.f32 %v450_v31, %v400_v26  ;;  %v567_v10 = vrot.slane %v1493_v8, 1  ;;  %vm564_vm9 = vcmask 1046528  }
  0x81   : > { %v483_v39 = vadd.f32 %v451_v32, %v401_v21  ;;  %v528_v44 = vrot.slane %v474_v43, 2  ;;  %v671_v18 = vlaneseq  ;;  %v642_v22 = vstv %s641_s30 }
  0x82   : > { %v542_v42 = vrot.slane %v481_v7, 3  ;;  %v544_v45 = vrot.slane %v482_v34, 2  ;;  %v1875_v19 = vadd.f32 %v594_v36, %v567_v10  ;;  %v1495_v23 = vmov 1966171168  }
  0x83   : > { %v546_v46 = vrot.slane %v483_v39, 1  ;;  %v530_v47 = vsel %vm529_vm6, %v528_v44, %v527_v35  ;;  %v669_v24 = vunpack.c.l.s4 %v1495_v23  ;;  %v672_v43 = vshrl.u32 %v671_v18, 7 }
  0x84   : > { %v543_v48 = vsel %vm526_vm5, %v542_v42, %v541_v15  ;;  %v533_v25 = vsel %vm532_vm7, %v531_v29, %v530_v47  ;;  %vm1135_vm10 = vcmask 7168   ;;  %vm1168_vm11 = vcmask 125952  }
  0x85   : > { %v545_v11 = vsel %vm529_vm6, %v544_v45, %v543_v48  ;;  %550 = vst.msk [vmem:[#allocation2 + $0x20] sm:$0xff] %vm486_vm0, %v533_v25  ;;  %v670_v32 = vunpack.c.0.s8 %v669_v24  ;;  %v1924_v48 = vsub.s32 0, %v672_v43  ;;  %v1926_v25 = vsub.s32 1, %v672_v43 }
  0x86   : > { %v547_v49 = vsel %vm532_vm7, %v546_v46, %v545_v11 }
  0x87   : > { %551 = vst.msk [vmem:[#allocation2 + $0x38] sm:$0xff] %vm486_vm0, %v547_v49  ;;  %v1922_v42 = vsub.s32 %v670_v32, %v672_v43 }
  0x8c   : > { %v555_v8 = vld [vmem:[#allocation2 + $0x20] sm:$0xff] }
  0x8d   : > { %v566_v50 = vrot.slane %v555_v8, 1  ;;  %v587_v51 = vrot.slane %v555_v8, 2 }
  0x8e   : > { %v557_v52 = vld [vmem:[#allocation2 + $0x38] sm:$0xff] }
  0x8f   : > { %v569_v53 = vrot.slane %v557_v52, 1  ;;  %v590_v54 = vrot.slane %v557_v52, 2  ;;  %v1880_v4 = vadd.f32 %v587_v51, %v566_v50 }
  0x91   : > { %v582_v55 = vadd.f32 %v569_v53, %v557_v52  ;;  %v595_v57 = vsel %vm585_vm8, %v590_v54, %v594_v36  ;;  %v570_v58 = vsel %vm564_vm9, %v566_v50, %v569_v53  ;;  %v591_v60 = vsel %vm585_vm8, %v587_v51, %v590_v54  ;;  %611 = vrot.lane.b32.xlu0 %v1880_v4, %s1492_s29 }
  0x92   : > { %v580_v59 = vadd.f32 %v570_v58, %v555_v8 }
  0x93   : > { %v607_v61 = vadd.f32 %v595_v57, %v582_v55 }
  0x94   : > { %v605_v62 = vadd.f32 %v591_v60, %v580_v59 }
  0x95   : > { %615 = vrot.lane.b32.xlu1 %v607_v61, %s1492_s29 }
  0x96   : > { %613 = vrot.lane.b32.xlu0 %v605_v62, %s1492_s29 }
  0x99   : > { %626 = vrot.lane.b32.xlu1 %v1880_v4, %s1494_s24 }
  0x9a   : > { %628 = vrot.lane.b32.xlu0 %v605_v62, %s1494_s24 }
  0x9d   : > { %630 = vrot.lane.b32.xlu1 %v607_v61, %s1494_s24 }
  0x9e   : > { %975 = vrot.lane.b32.xlu0 %v1671_v2, %s1492_s29 }
  0xa1   : > { %977 = vrot.lane.b32.xlu1 %v1674_v3, %s1492_s29 }
  0xa2   : > { %979 = vrot.lane.b32.xlu0 %v1747_v56, %s1492_s29 }
  0xa5   : > { %981 = vrot.lane.b32.xlu1 %v1778_v37, %s1492_s29 }
  0xa6   : > { %983 = vrot.lane.b32.xlu0 %v1781_v38, %s1492_s29 }
  0xa9   : > { %985 = vrot.lane.b32.xlu1 %v1822_v33, %s1492_s29 }
  0xaa   : > { %987 = vrot.lane.b32.xlu0 %v1827_v40, %s1492_s29 }
  0xad   : > { %989 = vrot.lane.b32.xlu1 %v1830_v41, %s1492_s29 }
  0xc1   : > { %v1904_v2 = vpop.permute.xlu0 %959  ;;  %v1906_v3 = vpop.permute.xlu1 %961 }
  0xc5   : > { %v1908_v56 = vpop.permute.xlu0 %963  ;;  %v1910_v63 = vpop.permute.xlu1 %965 }
  0xc9   : > { %v1912_v37 = vpop.permute.xlu0 %967  ;;  %v1914_v38 = vpop.permute.xlu1 %969 }
  0xcd   : > { %v1916_v0 = vpop.permute.xlu0 %971  ;;  %v1918_v33 = vpop.permute.xlu1 %973 }
 0x103   : > { %v612_v40 = vpop.permute.xlu0 %611 }
 0x104   : > { %v620_v57 = vadd.f32 %v612_v40, %v1875_v19  ;;  %v621_v58 = vadd.f32 %v612_v40, %v1880_v4 }
 0x107   : > { %v616_v1 = vpop.permute.xlu1 %615 }
 0x108   : > { %v614_v41 = vpop.permute.xlu0 %613  ;;  %v624_v6 = vadd.f32 %v616_v1, %v1875_v19  ;;  %v625_v15 = vadd.f32 %v616_v1, %v607_v61 }
 0x109   : > { %v622_v12 = vadd.f32 %v614_v41, %v1875_v19  ;;  %v623_v5 = vadd.f32 %v614_v41, %v605_v62 }
 0x10b   : > { %v627_v13 = vpop.permute.xlu1 %626 }
 0x10c   : > { %v629_v14 = vpop.permute.xlu0 %628  ;;  %v635_v19 = vadd.f32 %v627_v13, %v620_v57  ;;  %v636_v4 = vadd.f32 %v627_v13, %v621_v58 }
 0x10d   : > { %v637_v16 = vadd.f32 %v629_v14, %v622_v12  ;;  %v638_v17 = vadd.f32 %v629_v14, %v623_v5 }
 0x10e   : > { %v643_v13 = vadd.f32 %v642_v22, %v635_v19  ;;  %v644_v18 = vadd.f32 %v642_v22, %v636_v4 }
 0x10f   : > { %v631_v20 = vpop.permute.xlu1 %630  ;;  %v645_v9 = vadd.f32 %v642_v22, %v637_v16  ;;  %v646_v28 = vadd.f32 %v642_v22, %v638_v17 }
 0x110   : > { %v639_v27 = vadd.f32 %v631_v20, %v624_v6  ;;  %v640_v26 = vadd.f32 %v631_v20, %v625_v15  ;;  %v1958_v40 = vpop.permute.xlu0 %975 }
 0x111   : > { %v651_v30 = vmax.f32 %v645_v9, 0.5  ;;  %v652_v31 = vmax.f32 %v646_v28, 0.5  ;;  %v649_v28 = vmax.f32 %v643_v13, 0.5 }
 0x112   : > { %v647_v29 = vadd.f32 %v642_v22, %v639_v27  ;;  %v648_v21 = vadd.f32 %v642_v22, %v640_v26 }
 0x113   : > { %v657_v35 = vmin.f32 %v651_v30, 1.0  ;;  %v658_v36 = vmin.f32 %v652_v31, 1.0  ;;  %v978_v10 = vpop.permute.xlu1 %977 }
 0x114   : > { %v653_v7 = vmax.f32 %v647_v29, 0.5  ;;  %v654_v34 = vmax.f32 %v648_v21, 0.5  ;;  %v980_v27 = vpop.permute.xlu0 %979  ;;  %v650_v29 = vmax.f32 %v644_v18, 0.5 }
 0x115   : > { %v684_v47 = vcombine.low %v657_v35, %v658_v36  ;;  %v685_v8 = vcombine.high %v657_v35, %v658_v36  ;;  %v655_v35 = vmin.f32 %v649_v28, 1.0 }
 0x116   : > { %v659_v39 = vmin.f32 %v653_v7, 1.0  ;;  %v660_v44 = vmin.f32 %v654_v34, 1.0  ;;  %v656_v36 = vmin.f32 %v650_v29, 1.0 }
 0x117   : > { %v1933_v50 = vrot.slane %v684_v47, %v1922_v42  ;;  %v1940_v53 = vpop.permute.xlu1 %981  ;;  %v1947_v59 = vrot.slane %v685_v8, %v1922_v42 }
 0x118   : > { %v734_v45 = vcombine.low %v659_v39, %v660_v44  ;;  %v735_v46 = vcombine.high %v659_v39, %v660_v44  ;;  %v1989_v39 = vpop.permute.xlu0 %983  ;;  %v667_v8 = vcombine.high %v655_v35, %v656_v36 }
 0x119   : > { %v1953_v1 = vrot.slane %v1933_v50, %v1922_v42  ;;  %v715_v15 = vrot.slane %v1947_v59, %v1922_v42 }
 0x11a   : > { %v742_v11 = vrot.slane %v734_v45, %v1922_v42  ;;  %v1930_v49 = vrot.slane %v735_v46, %v1922_v42  ;;  %v700_v45 = vcombine.high %v1933_v50, %v1933_v50  ;;  %v674_v58 = vrot.slane %v667_v8, %v1922_v42 }
 0x11b   : > { %v986_v12 = vpop.permute.xlu1 %985  ;;  %v798_v6 = vrot.slane %v1953_v1, %v1926_v25  ;;  %v794_v17 = vrot.slane %v1953_v1, %v1924_v48  ;;  %v830_v24 = vrot.slane %v715_v15, %v1926_v25  ;;  %v826_v9 = vrot.slane %v715_v15, %v1924_v48 }
 0x11c   : > { %v758_v51 = vrot.slane %v742_v11, %v1922_v42  ;;  %v1938_v52 = vrot.slane %v1930_v49, %v1922_v42  ;;  %v750_v5 = vcombine.high %v742_v11, %v742_v11  ;;  %v731_v22 = vcombine.high %v715_v15, %v715_v15  ;;  %v988_v57 = vpop.permute.xlu0 %987 }
 0x11d   : > { %v1010_v23 = vmul.f32 %v1906_v3, %v798_v6  ;;  %v1009_v26 = vmul.f32 %v1906_v3, %v794_v17  ;;  %v751_v31 = vcombine.high %v1930_v49, %v1930_v49  ;;  %v1018_v32 = vmul.f32 %v1914_v38, %v830_v24 }
 0x11e   : > { %v858_v54 = vrot.slane %v758_v51, %v1924_v48  ;;  %v862_v55 = vrot.slane %v758_v51, %v1926_v25  ;;  %v894_v62 = vrot.slane %v1938_v52, %v1926_v25  ;;  %v890_v41 = vrot.slane %v1938_v52, %v1924_v48 }
 0x11f   : > { %v1970_v20 = vrot.slane %v750_v5, %v1922_v42  ;;  %v780_v21 = vcombine.high %v758_v51, %v758_v51  ;;  %v1017_v43 = vmul.f32 %v1914_v38, %v826_v9  ;;  %v846_v7 = vrot.slane %v731_v22, %v1926_v25 }
 0x120   : > { %v1025_v60 = vmul.f32 %v978_v10, %v858_v54  ;;  %v1026_v61 = vmul.f32 %v978_v10, %v862_v55  ;;  %v1034_v14 = vmul.f32 %v986_v12, %v894_v62  ;;  %v1033_v16 = vmul.f32 %v986_v12, %v890_v41 }
 0x121   : > { %v870_v30 = vrot.slane %v1970_v20, %v1926_v25  ;;  %v866_v3 = vrot.slane %v1970_v20, %v1924_v48  ;;  %v842_v34 = vrot.slane %v731_v22, %v1924_v48  ;;  %v1022_v44 = vmul.f32 %v1918_v33, %v846_v7 }
 0x122   : > { %1109 = vrot.lane.b32.xlu1 %v1026_v61, %s1496_s4  ;;  %1107 = vrot.lane.b32.xlu0 %v1025_v60, %s1496_s4  ;;  %v878_v38 = vrot.slane %v780_v21, %v1926_v25  ;;  %v779_v47 = vrot.slane %v751_v31, %v1922_v42  ;;  %v874_v11 = vrot.slane %v780_v21, %v1924_v48 }
 0x123   : > { %v1021_v10 = vmul.f32 %v1918_v33, %v842_v34  ;;  %v1028_v46 = vmul.f32 %v980_v27, %v870_v30  ;;  %v1027_v49 = vmul.f32 %v980_v27, %v866_v3  ;;  %v722_v54 = vrot.slane %v700_v45, %v1922_v42 }
 0x124   : > { %v1030_v51 = vmul.f32 %v1940_v53, %v878_v38  ;;  %v902_v33 = vrot.slane %v779_v47, %v1926_v25  ;;  %v1029_v50 = vmul.f32 %v1940_v53, %v874_v11  ;;  %v898_v55 = vrot.slane %v779_v47, %v1924_v48 }
 0x125   : > { %v701_v60 = vcombine.high %v1947_v59, %v1947_v59  ;;  %v806_v62 = vrot.slane %v722_v54, %v1926_v25  ;;  %v730_v41 = vcombine.high %v1953_v1, %v1953_v1  ;;  %v802_v53 = vrot.slane %v722_v54, %v1924_v48 }
 0x126   : > { %1125 = vrot.lane.b32.xlu1 %v1034_v14, %s1496_s4  ;;  %1123 = vrot.lane.b32.xlu0 %v1033_v16, %s1496_s4  ;;  %v1036_v61 = vmul.f32 %v988_v57, %v902_v33  ;;  %v1035_v19 = vmul.f32 %v988_v57, %v898_v55  ;;  %v675_v4 = vcombine.high %v674_v58, %v674_v58 }
 0x127   : > { %v729_v12 = vrot.slane %v701_v60, %v1922_v42  ;;  %v1012_v5 = vmul.f32 %v1908_v56, %v806_v62  ;;  %v814_v59 = vrot.slane %v730_v41, %v1926_v25  ;;  %v1011_v14 = vmul.f32 %v1908_v56, %v802_v53 }
 0x128   : > { %v810_v6 = vrot.slane %v730_v41, %v1924_v48  ;;  %v682_v16 = vrot.slane %v675_v4, %v1922_v42  ;;  %v782_v42 = vcombine.high %v1970_v20, %v1970_v20 }
 0x129   : > { %v1014_v1 = vmul.f32 %v1910_v63, %v814_v59  ;;  %v838_v15 = vrot.slane %v729_v12, %v1926_v25  ;;  %v834_v13 = vrot.slane %v729_v12, %v1924_v48  ;;  %v733_v20 = vcombine.high %v729_v12, %v729_v12 }
 0x12a   : > { %1077 = vrot.lane.b32.xlu1 %v1010_v23, %s1496_s4  ;;  %1075 = vrot.lane.b32.xlu0 %v1009_v26, %s1496_s4  ;;  %v1013_v17 = vmul.f32 %v1910_v63, %v810_v6  ;;  %v683_v18 = vcombine.high %v682_v16, %v682_v16  ;;  %v886_v27 = vrot.slane %v782_v42, %v1926_v25 }
 0x12b   : > { %v1020_v56 = vmul.f32 %v1916_v0, %v838_v15  ;;  %v1019_v23 = vmul.f32 %v1916_v0, %v834_v13  ;;  %v732_v0 = vcombine.high %v722_v54, %v722_v54  ;;  %v882_v9 = vrot.slane %v782_v42, %v1924_v48 }
 0x12c   : > { %v790_v63 = vrot.slane %v683_v18, %v1926_v25  ;;  %v786_v24 = vrot.slane %v683_v18, %v1924_v48  ;;  %v1032_v29 = vmul.f32 %v1989_v39, %v886_v27  ;;  %v854_v31 = vrot.slane %v733_v20, %v1926_v25 }
 0x12d   : > { %v822_v22 = vrot.slane %v732_v0, %v1926_v25  ;;  %v1031_v21 = vmul.f32 %v1989_v39, %v882_v9  ;;  %v818_v30 = vrot.slane %v732_v0, %v1924_v48  ;;  %v850_v3 = vrot.slane %v733_v20, %v1924_v48 }
 0x12e   : > { %1093 = vrot.lane.b32.xlu1 %v1018_v32, %s1496_s4  ;;  %1091 = vrot.lane.b32.xlu0 %v1017_v43, %s1496_s4  ;;  %v1008_v26 = vmul.f32 %v1904_v2, %v790_v63  ;;  %v1007_v28 = vmul.f32 %v1904_v2, %v786_v24  ;;  %v781_v2 = vcombine.high %v1938_v52, %v1938_v52  ;;  %v990_v52 = vpop.permute.xlu1 %989 }
 0x12f   : > { %v1016_v32 = vmul.f32 %v1912_v37, %v822_v22  ;;  %v1015_v43 = vmul.f32 %v1912_v37, %v818_v30  ;;  %v1024_v7 = vmul.f32 %v1958_v40, %v854_v31  ;;  %v1023_v35 = vmul.f32 %v1958_v40, %v850_v3 }
 0x130   : > { %v910_v34 = vrot.slane %v781_v2, %v1926_v25  ;;  %v906_v36 = vrot.slane %v781_v2, %v1924_v48 }
 0x132   : > { %1113 = vrot.lane.b32.xlu1 %v1028_v46, %s1496_s4  ;;  %1111 = vrot.lane.b32.xlu0 %v1027_v49, %s1496_s4  ;;  %v1038_v39 = vmul.f32 %v990_v52, %v910_v34  ;;  %v1037_v37 = vmul.f32 %v990_v52, %v906_v36 }
 0x136   : > { %1117 = vrot.lane.b32.xlu1 %v1030_v51, %s1496_s4  ;;  %1115 = vrot.lane.b32.xlu0 %v1029_v50, %s1496_s4 }
 0x13a   : > { %1129 = vrot.lane.b32.xlu1 %v1036_v61, %s1496_s4  ;;  %1127 = vrot.lane.b32.xlu0 %v1035_v19, %s1496_s4 }
 0x13e   : > { %1081 = vrot.lane.b32.xlu1 %v1012_v5, %s1496_s4  ;;  %1079 = vrot.lane.b32.xlu0 %v1011_v14, %s1496_s4 }
 0x142   : > { %1085 = vrot.lane.b32.xlu1 %v1014_v1, %s1496_s4  ;;  %1083 = vrot.lane.b32.xlu0 %v1013_v17, %s1496_s4 }
 0x146   : > { %1097 = vrot.lane.b32.xlu1 %v1020_v56, %s1496_s4  ;;  %1095 = vrot.lane.b32.xlu0 %v1019_v23, %s1496_s4 }
 0x14a   : > { %1101 = vrot.lane.b32.xlu1 %v1022_v44, %s1496_s4  ;;  %1099 = vrot.lane.b32.xlu0 %v1021_v10, %s1496_s4 }
 0x14e   : > { %1073 = vrot.lane.b32.xlu1 %v1008_v26, %s1496_s4  ;;  %1071 = vrot.lane.b32.xlu0 %v1007_v28, %s1496_s4 }
 0x152   : > { %1121 = vrot.lane.b32.xlu1 %v1032_v29, %s1496_s4  ;;  %1119 = vrot.lane.b32.xlu0 %v1031_v21, %s1496_s4 }
 0x156   : > { %1089 = vrot.lane.b32.xlu1 %v1016_v32, %s1496_s4  ;;  %1087 = vrot.lane.b32.xlu0 %v1015_v43, %s1496_s4 }
 0x15a   : > { %1105 = vrot.lane.b32.xlu1 %v1024_v7, %s1496_s4  ;;  %1103 = vrot.lane.b32.xlu0 %v1023_v35, %s1496_s4 }
 0x15e   : > { %1133 = vrot.lane.b32.xlu1 %v1038_v39, %s1496_s4  ;;  %1131 = vrot.lane.b32.xlu0 %v1037_v37, %s1496_s4 }
 0x194   : > { %v1110_v44 = vpop.permute.xlu1 %1109  ;;  %v1108_v10 = vpop.permute.xlu0 %1107 }
 0x195   : > { %v1145_v25 = vsel %vm1135_vm10, %v1108_v10, %v1110_v44 }
 0x196   : > { %1178 = vst.msk [vmem:[%s2072_s7 + $0x24] sm:$0xf] %vm1168_vm11, %v1145_v25 }
 0x198   : > { %v1126_v48 = vpop.permute.xlu1 %1125  ;;  %v1124_v40 = vpop.permute.xlu0 %1123 }
 0x199   : > { %v1149_v45 = vsel %vm1135_vm10, %v1124_v40, %v1126_v48 }
 0x19a   : > { %1182 = vst.msk [vmem:[%s2072_s7 + $0x34] sm:$0xf] %vm1168_vm11, %v1149_v45 }
 0x19c   : > { %v1078_v38 = vpop.permute.xlu1 %1077  ;;  %v1076_v46 = vpop.permute.xlu0 %1075 }
 0x19d   : > { %v1137_v47 = vsel %vm1135_vm10, %v1076_v46, %v1078_v38 }
 0x19e   : > { %1170 = vst.msk [vmem:[%s2072_s7 + $0x4] sm:$0xf] %vm1168_vm11, %v1137_v47 }
 0x1a0   : > { %v1094_v11 = vpop.permute.xlu1 %1093  ;;  %v1092_v49 = vpop.permute.xlu0 %1091 }
 0x1a1   : > { %v1141_v8 = vsel %vm1135_vm10, %v1092_v49, %v1094_v11 }
 0x1a2   : > { %1174 = vst.msk [vmem:[%s2072_s7 + $0x14] sm:$0xf] %vm1168_vm11, %v1141_v8 }
 0x1a4   : > { %v1114_v51 = vpop.permute.xlu1 %1113  ;;  %v1112_v33 = vpop.permute.xlu0 %1111 }
 0x1a5   : > { %v1146_v54 = vsel %vm1135_vm10, %v1112_v33, %v1114_v51 }
 0x1a6   : > { %1179 = vst.msk [vmem:[%s2072_s7 + $0x28] sm:$0xf] %vm1168_vm11, %v1146_v54 }
 0x1a8   : > { %v1118_v50 = vpop.permute.xlu1 %1117  ;;  %v1116_v55 = vpop.permute.xlu0 %1115 }
 0x1a9   : > { %v1147_v57 = vsel %vm1135_vm10, %v1116_v55, %v1118_v50 }
 0x1aa   : > { %1180 = vst.msk [vmem:[%s2072_s7 + $0x2c] sm:$0xf] %vm1168_vm11, %v1147_v57 }
 0x1ac   : > { %v1130_v58 = vpop.permute.xlu1 %1129  ;;  %v1128_v60 = vpop.permute.xlu0 %1127 }
 0x1ad   : > { %v1150_v61 = vsel %vm1135_vm10, %v1128_v60, %v1130_v58 }
 0x1ae   : > { %1183 = vst.msk [vmem:[%s2072_s7 + $0x38] sm:$0xf] %vm1168_vm11, %v1150_v61 }
 0x1b0   : > { %v1082_v62 = vpop.permute.xlu1 %1081  ;;  %v1080_v41 = vpop.permute.xlu0 %1079 }
 0x1b1   : > { %v1138_v19 = vsel %vm1135_vm10, %v1080_v41, %v1082_v62 }
 0x1b2   : > { %1171 = vst.msk [vmem:[%s2072_s7 + $0x8] sm:$0xf] %vm1168_vm11, %v1138_v19 }
 0x1b4   : > { %v1086_v53 = vpop.permute.xlu1 %1085  ;;  %v1084_v4 = vpop.permute.xlu0 %1083 }
 0x1b5   : > { %v1139_v12 = vsel %vm1135_vm10, %v1084_v4, %v1086_v53 }
 0x1b6   : > { %1172 = vst.msk [vmem:[%s2072_s7 + $0xc] sm:$0xf] %vm1168_vm11, %v1139_v12 }
 0x1b8   : > { %v1098_v5 = vpop.permute.xlu1 %1097  ;;  %v1096_v59 = vpop.permute.xlu0 %1095 }
 0x1b9   : > { %v1142_v14 = vsel %vm1135_vm10, %v1096_v59, %v1098_v5 }
 0x1ba   : > { %1175 = vst.msk [vmem:[%s2072_s7 + $0x18] sm:$0xf] %vm1168_vm11, %v1142_v14 }
 0x1bc   : > { %v1102_v6 = vpop.permute.xlu1 %1101  ;;  %v1100_v1 = vpop.permute.xlu0 %1099 }
 0x1bd   : > { %v1143_v15 = vsel %vm1135_vm10, %v1100_v1, %v1102_v6 }
 0x1be   : > { %1176 = vst.msk [vmem:[%s2072_s7 + $0x1c] sm:$0xf] %vm1168_vm11, %v1143_v15 }
 0x1c0   : > { %v1074_v16 = vpop.permute.xlu1 %1073  ;;  %v1072_v17 = vpop.permute.xlu0 %1071 }
 0x1c1   : > { %v1136_v13 = vsel %vm1135_vm10, %v1072_v17, %v1074_v16 }
 0x1c2   : > { %1169 = vst.msk [vmem:[%s2072_s7] sm:$0xf] %vm1168_vm11, %v1136_v13 }
 0x1c4   : > { %v1122_v56 = vpop.permute.xlu1 %1121  ;;  %v1120_v18 = vpop.permute.xlu0 %1119 }
 0x1c5   : > { %v1148_v23 = vsel %vm1135_vm10, %v1120_v18, %v1122_v56 }
 0x1c6   : > { %1181 = vst.msk [vmem:[%s2072_s7 + $0x30] sm:$0xf] %vm1168_vm11, %v1148_v23 }
 0x1c8   : > { %v1090_v42 = vpop.permute.xlu1 %1089  ;;  %v1088_v63 = vpop.permute.xlu0 %1087 }
 0x1c9   : > { %v1140_v24 = vsel %vm1135_vm10, %v1088_v63, %v1090_v42 }
 0x1ca   : > { %1173 = vst.msk [vmem:[%s2072_s7 + $0x10] sm:$0xf] %vm1168_vm11, %v1140_v24 }
 0x1cc   : > { %v1106_v27 = vpop.permute.xlu1 %1105  ;;  %v1104_v26 = vpop.permute.xlu0 %1103 }
 0x1cd   : > { %v1144_v0 = vsel %vm1135_vm10, %v1104_v26, %v1106_v27 }
 0x1ce   : > { %1177 = vst.msk [vmem:[%s2072_s7 + $0x20] sm:$0xf] %vm1168_vm11, %v1144_v0 }
 0x1d0   : > { %v1134_v9 = vpop.permute.xlu1 %1133  ;;  %v1132_v28 = vpop.permute.xlu0 %1131 }
 0x1d1   : > { %v1151_v20 = vsel %vm1135_vm10, %v1132_v28, %v1134_v9 }
 0x1d2   : > { %1184 = vst.msk [vmem:[%s2072_s7 + $0x3c] sm:$0xf] %vm1168_vm11, %v1151_v20 }
 0x1d3   : > { %1429 = shalt.err (!%p1426_p11)
}
 0x1d4   : > { %s1430_s27 = scalar_lea.hbm %s2123_s11, 1024  ;;  %s1434_s21 = scalar_lea.hbm %s2175_s3, 2048 }
 0x1d5   : > { %p1431_p0 = scmp.ne.s32.totalorder %s2123_s11, %s1430_s27  ;;  %p1435_p5 = scmp.lt.u32.totalorder %s2123_s11, %s2175_s3 }
 0x1d6   : > { %p1436_p12 = scmp.lt.u32.totalorder %s1434_s21, %s1430_s27  ;;  %p1438_p13 = scmp.lt.u32.totalorder %s1430_s27, %s2123_s11 }
 0x1d7   : > { %p1432_p2 = pnand %p1431_p0, %p2189_p3 }
 0x1d8   : > { %p1437_p6 = por %p1436_p12, %p1435_p5 }
 0x1d9   : > { %p1433_p7 = pneg %p1432_p2 }
 0x1da   : > { %p1439_p8 = por %p1438_p13, %p1437_p6 }
 0x1dc   : > { %p1440_p9 = pnand %p1439_p8, %p1433_p7 }
 0x1de   : > { %1443 = shalt.err (!%p1440_p9)
}
 0x1df   : > { %s1498_s30 = smov 64   ;;  %s1499_s4 = smov 4  }
 0x1e0   : > { %1311 = dma.vmem_to_hbm [thread:$0]  (%p2189_p3), %s2125_s8, 1024, %s2123_s11, %s1186_s1, %s1498_s30, %s1498_s30, %s1499_s4  }
 0x1e1 PF: > { %s1214_s7 = sand.u32 1, %s1474_s14   ;;  %p2190_p10 = scmp.ne.s32.totalorder %s2182_s26, 0 }
 0x1e2   : > { %p2191_p1 = scmp.ge.s32.totalorder %s1486_s17, 2  ;;  %s1215_s5 = scalar_lea.sflag [#allocation6], %s1214_s7 }
 0x1e4   : > { %p1322_p4 = pnand %p2191_p1, %p2190_p10 }
 0x1e6   : > { %1469 = dma.done.wait (!%p1322_p4), %s1215_s5, 1024  }
 0x1e7   : > { %1471 = vsyncadd (!%p1322_p4), %s1215_s5, 4294966272  ;;  %p18_p11 = scmp.ge.s32.totalorder %s1548_s19, 4   ;;  %s2192_s14 = smov %s1478_s15 }
 0x1e8   : > { %s2193_s15 = smov %s1482_s16  ;;  %s2194_s16 = smov %s1560_s22 }
 0x1e9   : > { %s2195_s17 = smov %s1548_s19  ;;  %20 = sbr.rel (!%p18_p11) target bundleno = 8 (0x8), region = 82 }
 0x1f0   :  { %1220 = vsyncpa [#allocation5], 1 }
 0x1f1   :  { %1222 = vsyncpa [#allocation5 + $0x1], 1 }
 0x1f2   :  { %1223 = vsyncpa [#allocation6], 1 }
 0x1f3   :  { %1225 = vsyncpa [#allocation6 + $0x1], 1 }
 0x1f4   :  { %1226 = vsyncpa [#allocation7], 1 }
 0x1f5   :  { %1228 = vsyncpa [#allocation7 + $0x1], 1 }

</bundles_post_ra>
